<compile_context>
chip_gen: v6e
topology: v6e:2x2x1
jax: 0.10.0
libtpu: 0.0.40
codegen_flags: <defaults>
</compile_context>

<pallas_src>
import jax
import jax.numpy as jnp
from jax.experimental import pallas as pl
from jax.experimental.pallas import tpu as pltpu


def regnet_kernel(x_ref,
                  w1_ref, b1_ref,
                  w2_ref, b2_ref,
                  w3_ref, b3_ref,
                  w4t_ref, b4_ref,
                  out_ref):
    # x tile: [TB, C_in] f32.  Cast MXU operands to bf16, accumulate in f32,
    # keep bias-add / relu in f32 on the VPU.
    x = x_ref[...]

    h = jnp.dot(x.astype(jnp.bfloat16), w1_ref[...],
                preferred_element_type=jnp.float32) + b1_ref[...]
    h = jnp.maximum(h, 0.0)

    h = jnp.dot(h.astype(jnp.bfloat16), w2_ref[...],
                preferred_element_type=jnp.float32) + b2_ref[...]
    h = jnp.maximum(h, 0.0)

    h = jnp.dot(h.astype(jnp.bfloat16), w3_ref[...],
                preferred_element_type=jnp.float32) + b3_ref[...]
    h = jnp.maximum(h, 0.0)

    # predict: contract feature axis of [1, n3] with feature axis of [TB, n3]
    # -> [1, TB] (batch on lanes).  Lane-dense result => unmasked stores.
    y = jax.lax.dot_general(
        w4t_ref[...], h.astype(jnp.bfloat16),
        dimension_numbers=(((1,), (1,)), ((), ())),
        preferred_element_type=jnp.float32)
    out_ref[...] = (y + b4_ref[...]).astype(out_ref.dtype)


def regnet_forward(x, params, *, tb=256):
    """x: [B, in_channels] f32. params: dict of (W, b) with W stored as [in, out]."""
    B, c_in = x.shape
    w1, b1 = params["input_layer"]
    w2, b2 = params["hidden1"]
    w3, b3 = params["hidden2"]
    w4, b4 = params["predict"]

    # MXU operands in bf16; biases stay f32 (added after the f32-accumulated dot).
    w1b = w1.astype(jnp.bfloat16)
    w2b = w2.astype(jnp.bfloat16)
    w3b = w3.astype(jnp.bfloat16)
    # predict weight as a [1, n3] row so the kernel emits a lane-dense [1, TB] tile.
    w4t = w4.reshape(1, -1).astype(jnp.bfloat16)
    b4r = b4.reshape(1, 1)

    padded_b = ((B + tb - 1) // tb) * tb
    if padded_b != B:
        x = jnp.pad(x, ((0, padded_b - B), (0, 0)))
    num_tiles = padded_b // tb

    def resident(arr):
        # Whole-array block with a constant index map: fetched once, stays in VMEM
        # across all grid steps.  (No closure over `arr` inside the lambda.)
        return pl.BlockSpec(arr.shape, lambda i: (0, 0))

    out = pl.pallas_call(
        regnet_kernel,
        out_shape=jax.ShapeDtypeStruct((1, padded_b), jnp.float32),
        grid=(num_tiles,),
        in_specs=[
            pl.BlockSpec((tb, c_in), lambda i: (i, 0)),   # x: tiled over batch rows
            resident(w1b), resident(b1),
            resident(w2b), resident(b2),
            resident(w3b), resident(b3),
            resident(w4t), resident(b4r),
        ],
        out_specs=pl.BlockSpec((1, tb), lambda i: (0, i)),  # lane-dense output slab
        compiler_params=pltpu.CompilerParams(
            dimension_semantics=("parallel",),  # shard batch tiles across TCs (v7x)
        ),
    )(x, w1b, b1, w2b, b2, w3b, b3, w4t, b4r)

    return out[0, :B].reshape(B, 1)


def init_linear(key, fan_in, fan_out):
    """Mimics nn.Linear default init (uniform +-1/sqrt(fan_in)).
    Returns W as [fan_in, fan_out] (pre-transposed for x @ W) and b as [1, fan_out]."""
    kw, kb = jax.random.split(key)
    bound = 1.0 / jnp.sqrt(jnp.float32(fan_in))
    W = jax.random.uniform(kw, (fan_in, fan_out), jnp.float32, -bound, bound)
    b = jax.random.uniform(kb, (1, fan_out), jnp.float32, -bound, bound)
    return W, b


if __name__ == "__main__":
    # config: in_channels=8, n1=32, n2=32, n3=32
    in_channels, n1, n2, n3 = 8, 32, 32, 32
    batch = 300  # not a multiple of the 256-row tile -> exercises padding + 2 grid steps

    key = jax.random.PRNGKey(0)
    k_x, k1, k2, k3, k4 = jax.random.split(key, 5)

    params = {
        "input_layer": init_linear(k1, in_channels, n1),
        "hidden1":     init_linear(k2, n1, n2),
        "hidden2":     init_linear(k3, n2, n3),
        "predict":     init_linear(k4, n3, 1),
    }

    x = jax.random.normal(k_x, (batch, in_channels), jnp.float32)

    out = jax.block_until_ready(jax.jit(regnet_forward)(x, params))
    assert out.shape == (batch, 1), out.shape

    # Reference with the same bf16-operand / f32-accumulate numerics as the kernel.
    def ref_bf16(x, p):
        def lin(h, w, b):
            return jnp.dot(h.astype(jnp.bfloat16), w.astype(jnp.bfloat16),
                           preferred_element_type=jnp.float32) + b
        h = jnp.maximum(lin(x, *p["input_layer"]), 0.0)
        h = jnp.maximum(lin(h, *p["hidden1"]), 0.0)
        h = jnp.maximum(lin(h, *p["hidden2"]), 0.0)
        return lin(h, *p["predict"])

    assert jnp.allclose(out, ref_bf16(x, params), atol=2e-3, rtol=2e-3)

    # Loose sanity check against the pure-f32 PyTorch-equivalent forward
    # (bf16 MXU operands => small numeric drift).
    def ref_f32(x, p):
        h = jnp.maximum(x @ p["input_layer"][0] + p["input_layer"][1], 0.0)
        h = jnp.maximum(h @ p["hidden1"][0] + p["hidden1"][1], 0.0)
        h = jnp.maximum(h @ p["hidden2"][0] + p["hidden2"][1], 0.0)
        return h @ p["predict"][0] + p["predict"][1]

    assert jnp.allclose(out, ref_f32(x, params), atol=1e-1, rtol=1e-1)

    print("KERNEL_OK")
</pallas_src>

<mosaic_0001>
module attributes {stable_mosaic.version = 11 : i64} {
  func.func @regnet_kernel(%arg0: i32, %arg1: memref<256x8xf32, #tpu.memory_space<vmem>>, %arg2: memref<8x32xbf16, #tpu.memory_space<vmem>>, %arg3: memref<1x32xf32, #tpu.memory_space<vmem>>, %arg4: memref<32x32xbf16, #tpu.memory_space<vmem>>, %arg5: memref<1x32xf32, #tpu.memory_space<vmem>>, %arg6: memref<32x32xbf16, #tpu.memory_space<vmem>>, %arg7: memref<1x32xf32, #tpu.memory_space<vmem>>, %arg8: memref<1x32xbf16, #tpu.memory_space<vmem>>, %arg9: memref<1x1xf32, #tpu.memory_space<vmem>>, %arg10: memref<1x256xf32, #tpu.memory_space<vmem>>) attributes {dimension_semantics = [#tpu.dimension_semantics<parallel>], iteration_bounds = array<i64: 2>, scalar_prefetch = 0 : i64, scratch_operands = 0 : i64, tpu.core_type = #tpu.core_type<tc>, window_params = [{transform_indices = @transform_0, window_bounds = array<i64: 256, 8>}, {pipeline_mode = #tpu.pipeline_mode<synchronous>, transform_indices = @transform_1, window_bounds = array<i64: 8, 32>}, {pipeline_mode = #tpu.pipeline_mode<synchronous>, transform_indices = @transform_2, window_bounds = array<i64: 1, 32>}, {pipeline_mode = #tpu.pipeline_mode<synchronous>, transform_indices = @transform_3, window_bounds = array<i64: 32, 32>}, {pipeline_mode = #tpu.pipeline_mode<synchronous>, transform_indices = @transform_4, window_bounds = array<i64: 1, 32>}, {pipeline_mode = #tpu.pipeline_mode<synchronous>, transform_indices = @transform_5, window_bounds = array<i64: 32, 32>}, {pipeline_mode = #tpu.pipeline_mode<synchronous>, transform_indices = @transform_6, window_bounds = array<i64: 1, 32>}, {pipeline_mode = #tpu.pipeline_mode<synchronous>, transform_indices = @transform_7, window_bounds = array<i64: 1, 32>}, {pipeline_mode = #tpu.pipeline_mode<synchronous>, transform_indices = @transform_8, window_bounds = array<i64: 1, 1>}, {transform_indices = @transform_9, window_bounds = array<i64: 1, 256>}]} {
    %c0 = arith.constant 0 : index
    %c0_0 = arith.constant 0 : index
    %0 = vector.load %arg1[%c0, %c0_0] : memref<256x8xf32, #tpu.memory_space<vmem>>, vector<256x8xf32>
    %1 = arith.truncf %0 : vector<256x8xf32> to vector<256x8xbf16>
    %c0_1 = arith.constant 0 : index
    %c0_2 = arith.constant 0 : index
    %2 = vector.load %arg2[%c0_1, %c0_2] : memref<8x32xbf16, #tpu.memory_space<vmem>>, vector<8x32xbf16>
    %cst = arith.constant dense<0.000000e+00> : vector<256x32xf32>
    %3 = tpu.matmul %1, %2, %cst {dimension_numbers = #tpu.dot_dimension_numbers<[1], [0], [0], [1], [0, 0, 1, 1], [], []>} : vector<256x8xbf16>, vector<8x32xbf16>, vector<256x32xf32> -> vector<256x32xf32>
    %c0_3 = arith.constant 0 : index
    %c0_4 = arith.constant 0 : index
    %4 = vector.load %arg3[%c0_3, %c0_4] : memref<1x32xf32, #tpu.memory_space<vmem>>, vector<1x32xf32>
    %5 = vector.broadcast %4 : vector<1x32xf32> to vector<256x32xf32>
    %6 = arith.addf %3, %5 : vector<256x32xf32>
    %cst_5 = arith.constant 0.000000e+00 : f32
    %7 = vector.broadcast %cst_5 : f32 to vector<256x32xf32>
    %8 = arith.maximumf %6, %7 : vector<256x32xf32>
    %9 = arith.truncf %8 : vector<256x32xf32> to vector<256x32xbf16>
    %c0_6 = arith.constant 0 : index
    %c0_7 = arith.constant 0 : index
    %10 = vector.load %arg4[%c0_6, %c0_7] : memref<32x32xbf16, #tpu.memory_space<vmem>>, vector<32x32xbf16>
    %cst_8 = arith.constant dense<0.000000e+00> : vector<256x32xf32>
    %11 = tpu.matmul %9, %10, %cst_8 {dimension_numbers = #tpu.dot_dimension_numbers<[1], [0], [0], [1], [0, 0, 1, 1], [], []>} : vector<256x32xbf16>, vector<32x32xbf16>, vector<256x32xf32> -> vector<256x32xf32>
    %c0_9 = arith.constant 0 : index
    %c0_10 = arith.constant 0 : index
    %12 = vector.load %arg5[%c0_9, %c0_10] : memref<1x32xf32, #tpu.memory_space<vmem>>, vector<1x32xf32>
    %13 = vector.broadcast %12 : vector<1x32xf32> to vector<256x32xf32>
    %14 = arith.addf %11, %13 : vector<256x32xf32>
    %cst_11 = arith.constant 0.000000e+00 : f32
    %15 = vector.broadcast %cst_11 : f32 to vector<256x32xf32>
    %16 = arith.maximumf %14, %15 : vector<256x32xf32>
    %17 = arith.truncf %16 : vector<256x32xf32> to vector<256x32xbf16>
    %c0_12 = arith.constant 0 : index
    %c0_13 = arith.constant 0 : index
    %18 = vector.load %arg6[%c0_12, %c0_13] : memref<32x32xbf16, #tpu.memory_space<vmem>>, vector<32x32xbf16>
    %cst_14 = arith.constant dense<0.000000e+00> : vector<256x32xf32>
    %19 = tpu.matmul %17, %18, %cst_14 {dimension_numbers = #tpu.dot_dimension_numbers<[1], [0], [0], [1], [0, 0, 1, 1], [], []>} : vector<256x32xbf16>, vector<32x32xbf16>, vector<256x32xf32> -> vector<256x32xf32>
    %c0_15 = arith.constant 0 : index
    %c0_16 = arith.constant 0 : index
    %20 = vector.load %arg7[%c0_15, %c0_16] : memref<1x32xf32, #tpu.memory_space<vmem>>, vector<1x32xf32>
    %21 = vector.broadcast %20 : vector<1x32xf32> to vector<256x32xf32>
    %22 = arith.addf %19, %21 : vector<256x32xf32>
    %cst_17 = arith.constant 0.000000e+00 : f32
    %23 = vector.broadcast %cst_17 : f32 to vector<256x32xf32>
    %24 = arith.maximumf %22, %23 : vector<256x32xf32>
    %c0_18 = arith.constant 0 : index
    %c0_19 = arith.constant 0 : index
    %25 = vector.load %arg8[%c0_18, %c0_19] : memref<1x32xbf16, #tpu.memory_space<vmem>>, vector<1x32xbf16>
    %26 = arith.truncf %24 : vector<256x32xf32> to vector<256x32xbf16>
    %cst_20 = arith.constant dense<0.000000e+00> : vector<1x256xf32>
    %27 = tpu.matmul %25, %26, %cst_20 {dimension_numbers = #tpu.dot_dimension_numbers<[1], [1], [0], [0], [0, 0, 1, 0], [], []>} : vector<1x32xbf16>, vector<256x32xbf16>, vector<1x256xf32> -> vector<1x256xf32>
    %c0_21 = arith.constant 0 : index
    %c0_22 = arith.constant 0 : index
    %28 = vector.load %arg9[%c0_21, %c0_22] : memref<1x1xf32, #tpu.memory_space<vmem>>, vector<1x1xf32>
    %29 = vector.broadcast %28 : vector<1x1xf32> to vector<1x256xf32>
    %30 = arith.addf %27, %29 : vector<1x256xf32>
    %c0_23 = arith.constant 0 : index
    %c0_24 = arith.constant 0 : index
    %31 = vector.load %arg10[%c0_23, %c0_24] : memref<1x256xf32, #tpu.memory_space<vmem>>, vector<1x256xf32>
    tpu.vector_store %arg10[%c0_23, %c0_24], %30 {strides = array<i32>} : memref<1x256xf32, #tpu.memory_space<vmem>>, vector<1x256xf32>,
    return
  }
  func.func @transform_0(%arg0: i32) -> (i32, i32) {
    %c0_i32 = arith.constant 0 : i32
    %c0_i32_0 = arith.constant 0 : i32
    return %arg0, %c0_i32 : i32, i32
  }
  func.func @transform_1(%arg0: i32) -> (i32, i32) {
    %c0_i32 = arith.constant 0 : i32
    %c0_i32_0 = arith.constant 0 : i32
    %c0_i32_1 = arith.constant 0 : i32
    return %c0_i32, %c0_i32_0 : i32, i32
  }
  func.func @transform_2(%arg0: i32) -> (i32, i32) {
    %c0_i32 = arith.constant 0 : i32
    %c0_i32_0 = arith.constant 0 : i32
    %c0_i32_1 = arith.constant 0 : i32
    return %c0_i32, %c0_i32_0 : i32, i32
  }
  func.func @transform_3(%arg0: i32) -> (i32, i32) {
    %c0_i32 = arith.constant 0 : i32
    %c0_i32_0 = arith.constant 0 : i32
    %c0_i32_1 = arith.constant 0 : i32
    return %c0_i32, %c0_i32_0 : i32, i32
  }
  func.func @transform_4(%arg0: i32) -> (i32, i32) {
    %c0_i32 = arith.constant 0 : i32
    %c0_i32_0 = arith.constant 0 : i32
    %c0_i32_1 = arith.constant 0 : i32
    return %c0_i32, %c0_i32_0 : i32, i32
  }
  func.func @transform_5(%arg0: i32) -> (i32, i32) {
    %c0_i32 = arith.constant 0 : i32
    %c0_i32_0 = arith.constant 0 : i32
    %c0_i32_1 = arith.constant 0 : i32
    return %c0_i32, %c0_i32_0 : i32, i32
  }
  func.func @transform_6(%arg0: i32) -> (i32, i32) {
    %c0_i32 = arith.constant 0 : i32
    %c0_i32_0 = arith.constant 0 : i32
    %c0_i32_1 = arith.constant 0 : i32
    return %c0_i32, %c0_i32_0 : i32, i32
  }
  func.func @transform_7(%arg0: i32) -> (i32, i32) {
    %c0_i32 = arith.constant 0 : i32
    %c0_i32_0 = arith.constant 0 : i32
    %c0_i32_1 = arith.constant 0 : i32
    return %c0_i32, %c0_i32_0 : i32, i32
  }
  func.func @transform_8(%arg0: i32) -> (i32, i32) {
    %c0_i32 = arith.constant 0 : i32
    %c0_i32_0 = arith.constant 0 : i32
    %c0_i32_1 = arith.constant 0 : i32
    return %c0_i32, %c0_i32_0 : i32, i32
  }
  func.func @transform_9(%arg0: i32) -> (i32, i32) {
    %c0_i32 = arith.constant 0 : i32
    %c0_i32_0 = arith.constant 0 : i32
    return %c0_i32, %arg0 : i32, i32
  }
}

</mosaic_0001>

<bundles_post_ra>
// kernel: regnet_forward.1
= control target key start
LH: loop header
LB: loop body
LE: loop exit
PB: predicated region body
PF: predicated region fallthrough
CT: control target
= control target key end

     0   :  { %s1725_s11 = smov 0   ;;  %s2024_s0 = inlined_call_operand.vmem [shape: f32[512,8], index: 0, kind: input, shape index: {}]   ;;  %s2025_s1 = inlined_call_operand.vmem [shape: bf16[8,32], index: 1, kind: input, shape index: {}]   ;;  %s2026_s2 = inlined_call_operand.vmem [shape: f32[1,32], index: 2, kind: input, shape index: {}]   ;;  %s2027_s3 = inlined_call_operand.vmem [shape: bf16[32,32], index: 3, kind: input, shape index: {}]   ;;  %s2028_s4 = inlined_call_operand.vmem [shape: f32[1,32], index: 4, kind: input, shape index: {}]   ;;  %s2029_s5 = inlined_call_operand.vmem [shape: bf16[32,32], index: 5, kind: input, shape index: {}]   ;;  %s2030_s6 = inlined_call_operand.vmem [shape: f32[1,32], index: 6, kind: input, shape index: {}]   ;;  %s2031_s7 = inlined_call_operand.vmem [shape: bf16[1,32], index: 7, kind: input, shape index: {}]   ;;  %s2032_s8 = inlined_call_operand.<no memory space> [shape: f32[1,1], index: 8, kind: input, shape index: {}]   ;;  %s2033_s9 = inlined_call_operand.vmem [shape: f32[1,512], index: 9, kind: output, shape index: {}]  }
   0x1   :  { %v14_v0 = vstv %s2032_s8 }
   0x2   :  { %15 = vst [vmem:[#allocation2] sm:$0x1] %v14_v0 }
   0x3 LB: > { %s1392_s12 = sadd.s32 4294967295, %s1668_s11   ;;  %p1396_p0 = scmp.ge.s32.totalorder %s1668_s11, 1  ;;  %s1668_s11 = sphi %s1725_s11, %s21_s11  }
   0x4   : > { %p290_p1 = scmp.lt.s32.totalorder %s1668_s11, 3 }
   0x6   : > { %p291_p2 = pnand %p1396_p0, %p290_p1 }
   0x7   : > { %s1397_s8 = sshll.u32 (!%p291_p2), %s1392_s12, 5  ;;  %s1399_s15 = sshll.u32 (!%p291_p2), %s1392_s12, 1 }
   0x8   : > { %294 = sbr.rel (%p291_p2) target bundleno = 959 (0x3bf), region = 56  ;;  %p326_p3 = scmp.lt.s32.totalorder (!%p291_p2), %s1397_s8, 63 }
   0x9   : > { %p332_p4 = scmp.lt.s32.totalorder (!%p291_p2), %s1399_s15, 3 }
   0xd   : > { %v385_v1 = vld [vmem:[%s2025_s1] sm:$0xf]  ;;  %vm442_vm0 = vcmask 1043456   ;;  %v1658_v2 = vld [vmem:[%s2027_s3 + $0x8] sm:$0xff]   ;;  %s2035_s8 = smov (!%p326_p3, %s1397_s8), 63  ;;  %vm393_vm1 = vcmask 64512  }
   0xe   : > { %1637 = vmatprep.subr.msk.bf16.mxu0 %vm442_vm0, %v385_v1  ;;  %v444_v3 = vsel %vm442_vm0, %v385_v1, 0  ;;  %1638 = vmatprep.subr.msk.bf16.mxu1 %vm442_vm0, %v385_v1  ;;  %s1398_s17 = sshll.u32 %s2035_s8, 3  ;;  %v1659_v52 = vld [vmem:[%s2027_s3] sm:$0xff]   ;;  %v1660_v53 = vld [vmem:[%s2029_s5 + $0x8] sm:$0xff]   ;;  %vm678_vm2 = vcmask 261120   ;;  %s2037_s15 = smov (!%p332_p4, %s1399_s15), 3 }
   0xf   : > { %1530 = vmatpush3.bf16.msra.mxu0 %v444_v3  ;;  %1636 = vmatpush3.bf16.msra.mxu1 %v444_v3  ;;  %s1744_s20 = scalar_lea.vmem %s2024_s0, %s1398_s17  ;;  %v1661_v54 = vld [vmem:[%s2029_s5] sm:$0xff]   ;;  %s334_s18 = scalar_lea.vmem %s2033_s9, %s2037_s15 }
  0x10   : > { %1563 = vmatprep.subr.bf16.mxu1 %v1658_v2  ;;  %v337_v4 = vld [vmem:[%s1744_s20] sm:$0xff]  ;;  %v338_v5 = vld [vmem:[%s1744_s20 + $0x8] sm:$0xff]  ;;  %v339_v6 = vld [vmem:[%s1744_s20 + $0x10] sm:$0xff]  ;;  %1599 = vmatprep.subr.bf16.mxu0 %v1660_v53 }
  0x11   : > { %v369_v7 = vpack.c.bf16 %v338_v5, %v337_v4  ;;  %v340_v8 = vld [vmem:[%s1744_s20 + $0x18] sm:$0xff]  ;;  %v341_v9 = vld [vmem:[%s1744_s20 + $0x20] sm:$0xff]  ;;  %v342_v10 = vld [vmem:[%s1744_s20 + $0x28] sm:$0xff] }
  0x12   : > { %v370_v11 = vpack.c.bf16 %v340_v8, %v339_v6  ;;  %v371_v12 = vpack.c.bf16 %v342_v10, %v341_v9  ;;  %v343_v13 = vld [vmem:[%s1744_s20 + $0x30] sm:$0xff]  ;;  %v344_v14 = vld [vmem:[%s1744_s20 + $0x38] sm:$0xff]  ;;  %v345_v15 = vld [vmem:[%s1744_s20 + $0x40] sm:$0xff] }
  0x13   : > { %1531 = vmatprep.mubr.msk.bf16.mxu0 %vm393_vm1, %v369_v7  ;;  %v346_v16 = vld [vmem:[%s1744_s20 + $0x48] sm:$0xff]  ;;  %v357_v17 = vld [vmem:[%s1744_s20 + $0xa0] sm:$0xff]  ;;  %v359_v19 = vld [vmem:[%s1744_s20 + $0xb0] sm:$0xff]  ;;  %v372_v21 = vpack.c.bf16 %v344_v14, %v343_v13 }
  0x14   : > { %1532 = vmatmul.mubr.msk.bf16.vlgmr.msra.gmra.mxu0 %vm393_vm1, %v370_v11  ;;  %v358_v18 = vld [vmem:[%s1744_s20 + $0xa8] sm:$0xff]  ;;  %v360_v20 = vld [vmem:[%s1744_s20 + $0xb8] sm:$0xff]  ;;  %v361_v24 = vld [vmem:[%s1744_s20 + $0xc0] sm:$0xff]  ;;  %v373_v26 = vpack.c.bf16 %v346_v16, %v345_v15 }
  0x15   : > { %1535 = vmatprep.mubr.msk.bf16.mxu0 %vm393_vm1, %v371_v12  ;;  %v379_v22 = vpack.c.bf16 %v358_v18, %v357_v17  ;;  %v380_v23 = vpack.c.bf16 %v360_v20, %v359_v19  ;;  %v362_v25 = vld [vmem:[%s1744_s20 + $0xc8] sm:$0xff]  ;;  %v347_v28 = vld [vmem:[%s1744_s20 + $0x50] sm:$0xff]  ;;  %v364_v30 = vld [vmem:[%s1744_s20 + $0xd8] sm:$0xff]  ;;  %1600 = vmatpush3.bf16.msra.mxu0 %v1660_v53 }
  0x16   : > { %v381_v27 = vpack.c.bf16 %v362_v25, %v361_v24  ;;  %v363_v29 = vld [vmem:[%s1744_s20 + $0xd0] sm:$0xff]  ;;  %v348_v31 = vld [vmem:[%s1744_s20 + $0x58] sm:$0xff]  ;;  %v365_v32 = vld [vmem:[%s1744_s20 + $0xe0] sm:$0xff]  ;;  %1601 = vmatprep.subr.bf16.mxu0 %v1661_v54 }
  0x17   : > { %1551 = vmatprep.mubr.msk.bf16.mxu1 %vm393_vm1, %v379_v22  ;;  %v366_v33 = vld [vmem:[%s1744_s20 + $0xe8] sm:$0xff]  ;;  %v349_v34 = vld [vmem:[%s1744_s20 + $0x60] sm:$0xff]  ;;  %v382_v36 = vpack.c.bf16 %v364_v30, %v363_v29  ;;  %v374_v37 = vpack.c.bf16 %v348_v31, %v347_v28  ;;  %v367_v40 = vld [vmem:[%s1744_s20 + $0xf0] sm:$0xff] }
  0x18   : > { %1552 = vmatmul.mubr.msk.bf16.vlgmr.msra.gmra.mxu1 %vm393_vm1, %v380_v23  ;;  %v350_v35 = vld [vmem:[%s1744_s20 + $0x68] sm:$0xff]  ;;  %v383_v38 = vpack.c.bf16 %v366_v33, %v365_v32  ;;  %v368_v41 = vld [vmem:[%s1744_s20 + $0xf8] sm:$0xff]  ;;  %v351_v42 = vld [vmem:[%s1744_s20 + $0x70] sm:$0xff] }
  0x19   : > { %1555 = vmatprep.mubr.msk.bf16.mxu1 %vm393_vm1, %v381_v27  ;;  %1564 = vmatpush3.bf16.msra.mxu1 %v1658_v2  ;;  %v375_v39 = vpack.c.bf16 %v350_v35, %v349_v34  ;;  %v352_v43 = vld [vmem:[%s1744_s20 + $0x78] sm:$0xff]  ;;  %v353_v44 = vld [vmem:[%s1744_s20 + $0x80] sm:$0xff]  ;;  %v354_v45 = vld [vmem:[%s1744_s20 + $0x88] sm:$0xff]  ;;  %v384_v46 = vpack.c.bf16 %v368_v41, %v367_v40 }
  0x1a   : > { %v376_v47 = vpack.c.bf16 %v352_v43, %v351_v42  ;;  %v377_v48 = vpack.c.bf16 %v354_v45, %v353_v44  ;;  %v355_v49 = vld [vmem:[%s1744_s20 + $0x90] sm:$0xff]  ;;  %v356_v50 = vld [vmem:[%s1744_s20 + $0x98] sm:$0xff]  ;;  %1565 = vmatprep.subr.bf16.mxu1 %v1659_v52  ;;  %1602 = vmatpush3.bf16.msra.mxu0 %v1661_v54  ;;  %v1806_v57 = vld [vmem:[%s2026_s2] ss:$0 sm:$0xff] }
  0x1b   : > { %v378_v51 = vpack.c.bf16 %v356_v50, %v355_v49 }
  0x1c   : > { %1536 = vmatmul.mubr.msk.bf16.gmra.mxu0 %vm393_vm1, %v372_v21 }
  0x1d   : > { %1539 = vmatprep.mubr.msk.bf16.mxu0 %vm393_vm1, %v373_v26  ;;  %1566 = vmatpush3.bf16.msra.mxu1 %v1659_v52 }
  0x20   : > { %1556 = vmatmul.mubr.msk.bf16.gmra.mxu1 %vm393_vm1, %v382_v36 }
  0x21   : > { %1559 = vmatprep.mubr.msk.bf16.mxu1 %vm393_vm1, %v383_v38 }
  0x24   : > { %1540 = vmatmul.mubr.msk.bf16.gmra.mxu0 %vm393_vm1, %v374_v37 }
  0x25   : > { %1543 = vmatprep.mubr.msk.bf16.mxu0 %vm393_vm1, %v375_v39 }
  0x28   : > { %1560 = vmatmul.mubr.msk.bf16.gmra.mxu1 %vm393_vm1, %v384_v46 }
  0x2c   : > { %1544 = vmatmul.mubr.msk.bf16.gmra.mxu0 %vm393_vm1, %v376_v47 }
  0x2d   : > { %1547 = vmatprep.mubr.msk.bf16.mxu0 %vm393_vm1, %v377_v48 }
  0x34   : > { %1548 = vmatmul.mubr.msk.bf16.gmra.mxu0 %vm393_vm1, %v378_v51 }
  0xd4   : > { %v1533_v55 = vpop.f32.mrf.mxu0 }
  0xd5   : > { %v489_v61 = vadd.f32 %v1533_v55, %v1806_v57 }
  0xd6   : > { %v480_v56 = vpop.f32.mrf.mxu0 }
  0xd7   : > { %v481_v59 = vadd.f32 %v1806_v57, %v480_v56  ;;  %v609_v6 = vmax.f32 %v489_v61, 0.0 }
  0xd8   : > { %v1534_v58 = vpop.f32.mrf.mxu0  ;;  %v1812_v0 = vpop.f32.mrf.mxu1 }
  0xd9   : > { %v492_v60 = vadd.f32 %v1534_v58, %v1806_v57  ;;  %v607_v3 = vmax.f32 %v481_v59, 0.0 }
  0xda   : > { %v483_v62 = vpop.f32.mrf.mxu0  ;;  %v560_v5 = vpop.f32.mrf.mxu1 }
  0xdb   : > { %v484_v63 = vadd.f32 %v1806_v57, %v483_v62  ;;  %v610_v1 = vmax.f32 %v492_v60, 0.0  ;;  %v561_v58 = vadd.f32 %v1806_v57, %v560_v5 }
  0xdc   : > { %v1537_v2 = vpop.f32.mrf.mxu0  ;;  %v1814_v11 = vpop.f32.mrf.mxu1 }
  0xdd   : > { %v608_v4 = vmax.f32 %v484_v63, 0.0  ;;  %v640_v9 = vpack.c.bf16 %v610_v1, %v609_v6  ;;  %v505_v14 = vadd.f32 %v1537_v2, %v1806_v57 }
  0xde   : > { %v496_v7 = vpop.f32.mrf.mxu0  ;;  %v563_v19 = vpop.f32.mrf.mxu1 }
  0xdf   : > { %v639_v8 = vpack.c.bf16 %v608_v4, %v607_v3  ;;  %v497_v12 = vadd.f32 %v1806_v57, %v496_v7  ;;  %v613_v22 = vmax.f32 %v505_v14, 0.0  ;;  %v564_v59 = vadd.f32 %v1806_v57, %v563_v19 }
  0xe0   : > { %v1538_v10 = vpop.f32.mrf.mxu0  ;;  %v1822_v27 = vpop.f32.mrf.mxu1  ;;  %v627_v4 = vmax.f32 %v561_v58, 0.0  ;;  %v572_v19 = vadd.f32 %v1814_v11, %v1806_v57 }
  0xe1   : > { %v508_v13 = vadd.f32 %v1538_v10, %v1806_v57  ;;  %1567 = vmatprep.mubr.msk.bf16.mxu1 %vm678_vm2, %v639_v8  ;;  %v611_v20 = vmax.f32 %v497_v12, 0.0  ;;  %v628_v5 = vmax.f32 %v564_v59, 0.0  ;;  %v585_v11 = vadd.f32 %v1822_v27, %v1806_v57 }
  0xe2   : > { %v499_v15 = vpop.f32.mrf.mxu0  ;;  %1568 = vmatmul.mubr.msk.bf16.vlgmr.msra.gmra.mxu1 %vm678_vm2, %v640_v9  ;;  %v576_v35 = vpop.f32.mrf.mxu1 }
  0xe3   : > { %v500_v16 = vadd.f32 %v1806_v57, %v499_v15  ;;  %v614_v17 = vmax.f32 %v508_v13, 0.0  ;;  %v649_v14 = vpack.c.bf16 %v628_v5, %v627_v4  ;;  %v577_v15 = vadd.f32 %v1806_v57, %v576_v35 }
  0xe4   : > { %v1541_v18 = vpop.f32.mrf.mxu0  ;;  %v1558_v43 = vpop.f32.mrf.mxu1 }
  0xe5   : > { %v612_v21 = vmax.f32 %v500_v16, 0.0  ;;  %v642_v25 = vpack.c.bf16 %v614_v17, %v613_v22  ;;  %v521_v30 = vadd.f32 %v1541_v18, %v1806_v57  ;;  %v569_v17 = vadd.f32 %v1812_v0, %v1806_v57 }
  0xe6   : > { %v512_v23 = vpop.f32.mrf.mxu0  ;;  %v579_v51 = vpop.f32.mrf.mxu1 }
  0xe7   : > { %v641_v24 = vpack.c.bf16 %v612_v21, %v611_v20  ;;  %v513_v28 = vadd.f32 %v1806_v57, %v512_v23  ;;  %v617_v38 = vmax.f32 %v521_v30, 0.0  ;;  %v580_v16 = vadd.f32 %v1806_v57, %v579_v51 }
  0xe8   : > { %v1542_v26 = vpop.f32.mrf.mxu0  ;;  %v1561_v62 = vpop.f32.mrf.mxu1  ;;  %v631_v21 = vmax.f32 %v577_v15, 0.0  ;;  %v629_v23 = vmax.f32 %v569_v17, 0.0  ;;  %v588_v30 = vadd.f32 %v1558_v43, %v1806_v57  ;;  %v1868_v43 = vld [vmem:[%s2028_s4] ss:$0 sm:$0xff] }
  0xe9   : > { %v524_v29 = vadd.f32 %v1542_v26, %v1806_v57  ;;  %1571 = vmatprep.mubr.msk.bf16.mxu1 %vm678_vm2, %v641_v24  ;;  %v615_v36 = vmax.f32 %v513_v28, 0.0  ;;  %v632_v22 = vmax.f32 %v580_v16, 0.0  ;;  %v630_v24 = vmax.f32 %v572_v19, 0.0 }
  0xea   : > { %v515_v31 = vpop.f32.mrf.mxu0  ;;  %1572 = vmatmul.mubr.msk.bf16.gmra.mxu1 %vm678_vm2, %v642_v25  ;;  %v592_v8 = vpop.f32.mrf.mxu1 }
  0xeb   : > { %v516_v32 = vadd.f32 %v1806_v57, %v515_v31  ;;  %v618_v33 = vmax.f32 %v524_v29, 0.0  ;;  %v651_v26 = vpack.c.bf16 %v632_v22, %v631_v21  ;;  %v593_v28 = vadd.f32 %v1806_v57, %v592_v8 }
  0xec   : > { %v1545_v34 = vpop.f32.mrf.mxu0  ;;  %v1562_v20 = vpop.f32.mrf.mxu1  ;;  %v650_v29 = vpack.c.bf16 %v630_v24, %v629_v23 }
  0xed   : > { %v616_v37 = vmax.f32 %v516_v32, 0.0  ;;  %v644_v41 = vpack.c.bf16 %v618_v33, %v617_v38  ;;  %v537_v46 = vadd.f32 %v1545_v34, %v1806_v57  ;;  %v635_v31 = vmax.f32 %v593_v28, 0.0 }
  0xee   : > { %v528_v39 = vpop.f32.mrf.mxu0  ;;  %v595_v25 = vpop.f32.mrf.mxu1  ;;  %v633_v33 = vmax.f32 %v585_v11, 0.0  ;;  %v634_v34 = vmax.f32 %v588_v30, 0.0  ;;  %v604_v38 = vadd.f32 %v1562_v20, %v1806_v57 }
  0xef   : > { %v643_v40 = vpack.c.bf16 %v616_v37, %v615_v36  ;;  %v529_v44 = vadd.f32 %v1806_v57, %v528_v39  ;;  %v621_v54 = vmax.f32 %v537_v46, 0.0  ;;  %v596_v0 = vadd.f32 %v1806_v57, %v595_v25 }
  0xf0   : > { %v1546_v42 = vpop.f32.mrf.mxu0  ;;  %v652_v36 = vpack.c.bf16 %v634_v34, %v633_v33  ;;  %v601_v37 = vadd.f32 %v1561_v62, %v1806_v57  ;;  %v638_v39 = vmax.f32 %v604_v38, 0.0 }
  0xf1   : > { %v540_v45 = vadd.f32 %v1546_v42, %v1806_v57  ;;  %1575 = vmatprep.mubr.msk.bf16.mxu1 %vm678_vm2, %v643_v40  ;;  %v619_v52 = vmax.f32 %v529_v44, 0.0  ;;  %v636_v32 = vmax.f32 %v596_v0, 0.0 }
  0xf2   : > { %v531_v47 = vpop.f32.mrf.mxu0  ;;  %1576 = vmatmul.mubr.msk.bf16.gmra.mxu1 %vm678_vm2, %v644_v41  ;;  %v637_v27 = vmax.f32 %v601_v37, 0.0 }
  0xf3   : > { %v532_v48 = vadd.f32 %v1806_v57, %v531_v47  ;;  %v622_v49 = vmax.f32 %v540_v45, 0.0  ;;  %v653_v35 = vpack.c.bf16 %v636_v32, %v635_v31 }
  0xf4   : > { %v1549_v50 = vpop.f32.mrf.mxu0  ;;  %v654_v40 = vpack.c.bf16 %v638_v39, %v637_v27 }
  0xf5   : > { %v620_v53 = vmax.f32 %v532_v48, 0.0  ;;  %v646_v60 = vpack.c.bf16 %v622_v49, %v621_v54  ;;  %v553_v2 = vadd.f32 %v1549_v50, %v1806_v57 }
  0xf6   : > { %v544_v55 = vpop.f32.mrf.mxu0 }
  0xf7   : > { %v645_v56 = vpack.c.bf16 %v620_v53, %v619_v52  ;;  %v545_v63 = vadd.f32 %v1806_v57, %v544_v55  ;;  %v625_v12 = vmax.f32 %v553_v2, 0.0 }
  0xf8   : > { %v1550_v61 = vpop.f32.mrf.mxu0 }
  0xf9   : > { %v556_v1 = vadd.f32 %v1550_v61, %v1806_v57  ;;  %1579 = vmatprep.mubr.msk.bf16.mxu1 %vm678_vm2, %v645_v56  ;;  %v623_v9 = vmax.f32 %v545_v63, 0.0 }
  0xfa   : > { %v547_v3 = vpop.f32.mrf.mxu0  ;;  %1580 = vmatmul.mubr.msk.bf16.gmra.mxu1 %vm678_vm2, %v646_v60 }
  0xfb   : > { %v548_v6 = vadd.f32 %v1806_v57, %v547_v3  ;;  %v626_v7 = vmax.f32 %v556_v1, 0.0 }
  0xfd   : > { %v624_v10 = vmax.f32 %v548_v6, 0.0  ;;  %v648_v18 = vpack.c.bf16 %v626_v7, %v625_v12 }
  0xff   : > { %v647_v13 = vpack.c.bf16 %v624_v10, %v623_v9 }
 0x101   : > { %1583 = vmatprep.mubr.msk.bf16.mxu1 %vm678_vm2, %v647_v13 }
 0x102   : > { %1584 = vmatmul.mubr.msk.bf16.gmra.mxu1 %vm678_vm2, %v648_v18 }
 0x103   : > { %1587 = vmatprep.mubr.msk.bf16.mxu1 %vm678_vm2, %v649_v14 }
 0x10a   : > { %1588 = vmatmul.mubr.msk.bf16.gmra.mxu1 %vm678_vm2, %v650_v29 }
 0x10b   : > { %1591 = vmatprep.mubr.msk.bf16.mxu1 %vm678_vm2, %v651_v26 }
 0x112   : > { %1592 = vmatmul.mubr.msk.bf16.gmra.mxu1 %vm678_vm2, %v652_v36 }
 0x113   : > { %1595 = vmatprep.mubr.msk.bf16.mxu1 %vm678_vm2, %v653_v35 }
 0x11a   : > { %1596 = vmatmul.mubr.msk.bf16.gmra.mxu1 %vm678_vm2, %v654_v40 }
 0x1a2   : > { %v1569_v41 = vpop.f32.mrf.mxu1 }
 0x1a3   : > { %v770_v46 = vadd.f32 %v1569_v41, %v1868_v43 }
 0x1a4   : > { %v761_v42 = vpop.f32.mrf.mxu1 }
 0x1a5   : > { %v762_v45 = vadd.f32 %v1868_v43, %v761_v42  ;;  %v890_v53 = vmax.f32 %v770_v46, 0.0 }
 0x1a6   : > { %v1570_v44 = vpop.f32.mrf.mxu1 }
 0x1a7   : > { %v773_v57 = vadd.f32 %v1570_v44, %v1868_v43  ;;  %v888_v51 = vmax.f32 %v762_v45, 0.0 }
 0x1a8   : > { %v764_v47 = vpop.f32.mrf.mxu1 }
 0x1a9   : > { %v765_v48 = vadd.f32 %v1868_v43, %v764_v47  ;;  %v891_v49 = vmax.f32 %v773_v57, 0.0 }
 0x1aa   : > { %v1573_v50 = vpop.f32.mrf.mxu1 }
 0x1ab   : > { %v889_v52 = vmax.f32 %v765_v48, 0.0  ;;  %v921_v56 = vpack.c.bf16 %v891_v49, %v890_v53  ;;  %v786_v61 = vadd.f32 %v1573_v50, %v1868_v43 }
 0x1ac   : > { %v777_v54 = vpop.f32.mrf.mxu1 }
 0x1ad   : > { %v920_v55 = vpack.c.bf16 %v889_v52, %v888_v51  ;;  %v778_v59 = vadd.f32 %v1868_v43, %v777_v54  ;;  %v894_v6 = vmax.f32 %v786_v61, 0.0 }
 0x1ae   : > { %v1574_v58 = vpop.f32.mrf.mxu1 }
 0x1af   : > { %v789_v60 = vadd.f32 %v1574_v58, %v1868_v43  ;;  %1603 = vmatprep.mubr.msk.bf16.mxu0 %vm678_vm2, %v920_v55  ;;  %v892_v3 = vmax.f32 %v778_v59, 0.0 }
 0x1b0   : > { %v780_v62 = vpop.f32.mrf.mxu1  ;;  %1604 = vmatmul.mubr.msk.bf16.vlgmr.msra.gmra.mxu0 %vm678_vm2, %v921_v56 }
 0x1b1   : > { %v781_v63 = vadd.f32 %v1868_v43, %v780_v62  ;;  %v895_v1 = vmax.f32 %v789_v60, 0.0 }
 0x1b2   : > { %v1577_v2 = vpop.f32.mrf.mxu1 }
 0x1b3   : > { %v893_v4 = vmax.f32 %v781_v63, 0.0  ;;  %v923_v8 = vpack.c.bf16 %v895_v1, %v894_v6  ;;  %v802_v13 = vadd.f32 %v1577_v2, %v1868_v43 }
 0x1b4   : > { %v793_v5 = vpop.f32.mrf.mxu1 }
 0x1b5   : > { %v922_v7 = vpack.c.bf16 %v893_v4, %v892_v3  ;;  %v794_v10 = vadd.f32 %v1868_v43, %v793_v5  ;;  %v898_v20 = vmax.f32 %v802_v13, 0.0 }
 0x1b6   : > { %v1578_v9 = vpop.f32.mrf.mxu1 }
 0x1b7   : > { %v805_v12 = vadd.f32 %v1578_v9, %v1868_v43  ;;  %1607 = vmatprep.mubr.msk.bf16.mxu0 %vm678_vm2, %v922_v7  ;;  %v896_v18 = vmax.f32 %v794_v10, 0.0 }
 0x1b8   : > { %v796_v14 = vpop.f32.mrf.mxu1  ;;  %1608 = vmatmul.mubr.msk.bf16.gmra.mxu0 %vm678_vm2, %v923_v8 }
 0x1b9   : > { %v797_v15 = vadd.f32 %v1868_v43, %v796_v14  ;;  %v899_v16 = vmax.f32 %v805_v12, 0.0 }
 0x1ba   : > { %v1581_v17 = vpop.f32.mrf.mxu1 }
 0x1bb   : > { %v897_v19 = vmax.f32 %v797_v15, 0.0  ;;  %v925_v23 = vpack.c.bf16 %v899_v16, %v898_v20  ;;  %v818_v28 = vadd.f32 %v1581_v17, %v1868_v43 }
 0x1bc   : > { %v809_v21 = vpop.f32.mrf.mxu1 }
 0x1bd   : > { %v924_v22 = vpack.c.bf16 %v897_v19, %v896_v18  ;;  %v810_v25 = vadd.f32 %v1868_v43, %v809_v21  ;;  %v902_v33 = vmax.f32 %v818_v28, 0.0 }
 0x1be   : > { %v1582_v24 = vpop.f32.mrf.mxu1 }
 0x1bf   : > { %v821_v26 = vadd.f32 %v1582_v24, %v1868_v43  ;;  %1611 = vmatprep.mubr.msk.bf16.mxu0 %vm678_vm2, %v924_v22  ;;  %v900_v31 = vmax.f32 %v810_v25, 0.0 }
 0x1c0   : > { %v812_v0 = vpop.f32.mrf.mxu1  ;;  %1612 = vmatmul.mubr.msk.bf16.gmra.mxu0 %vm678_vm2, %v925_v23 }
 0x1c1   : > { %v813_v29 = vadd.f32 %v1868_v43, %v812_v0  ;;  %v903_v11 = vmax.f32 %v821_v26, 0.0 }
 0x1c2   : > { %v1585_v30 = vpop.f32.mrf.mxu1 }
 0x1c3   : > { %v901_v32 = vmax.f32 %v813_v29, 0.0  ;;  %v927_v36 = vpack.c.bf16 %v903_v11, %v902_v33  ;;  %v834_v39 = vadd.f32 %v1585_v30, %v1868_v43  ;;  %v1921_v29 = vld [vmem:[%s2031_s7] sm:$0x1] }
 0x1c4   : > { %v825_v34 = vpop.f32.mrf.mxu1  ;;  %1527 = vmatprep.mubr.msk.bf16.mxu1 %vm678_vm2, %v1921_v29 }
 0x1c5   : > { %v926_v35 = vpack.c.bf16 %v901_v32, %v900_v31  ;;  %v826_v38 = vadd.f32 %v1868_v43, %v825_v34  ;;  %v906_v46 = vmax.f32 %v834_v39, 0.0  ;;  %v1217_v32 = vld [vmem:[#allocation2] sm:$0x1]  ;;  %v1670_v34 = vmov 0  }
 0x1c6   : > { %v1586_v37 = vpop.f32.mrf.mxu1  ;;  %1657 = vset.pattern.permute.xlu0 %v1670_v34 }
 0x1c7   : > { %v837_v27 = vadd.f32 %v1586_v37, %v1868_v43  ;;  %1615 = vmatprep.mubr.msk.bf16.mxu0 %vm678_vm2, %v926_v35  ;;  %v904_v45 = vmax.f32 %v826_v38, 0.0  ;;  %1220 = vperm.xlu0 %1657, %v1217_v32  }
 0x1c8   : > { %v828_v40 = vpop.f32.mrf.mxu1  ;;  %1616 = vmatmul.mubr.msk.bf16.gmra.mxu0 %vm678_vm2, %v927_v36 }
 0x1c9   : > { %v829_v41 = vadd.f32 %v1868_v43, %v828_v40  ;;  %v907_v42 = vmax.f32 %v837_v27, 0.0 }
 0x1ca   : > { %v1589_v44 = vpop.f32.mrf.mxu1 }
 0x1cb   : > { %v905_v57 = vmax.f32 %v829_v41, 0.0  ;;  %v929_v49 = vpack.c.bf16 %v907_v42, %v906_v46  ;;  %v850_v53 = vadd.f32 %v1589_v44, %v1868_v43 }
 0x1cc   : > { %v841_v47 = vpop.f32.mrf.mxu1 }
 0x1cd   : > { %v928_v48 = vpack.c.bf16 %v905_v57, %v904_v45  ;;  %v842_v51 = vadd.f32 %v1868_v43, %v841_v47  ;;  %v910_v61 = vmax.f32 %v850_v53, 0.0 }
 0x1ce   : > { %v1590_v50 = vpop.f32.mrf.mxu1 }
 0x1cf   : > { %v853_v52 = vadd.f32 %v1590_v50, %v1868_v43  ;;  %1619 = vmatprep.mubr.msk.bf16.mxu0 %vm678_vm2, %v928_v48  ;;  %v908_v59 = vmax.f32 %v842_v51, 0.0 }
 0x1d0   : > { %v844_v54 = vpop.f32.mrf.mxu1  ;;  %1620 = vmatmul.mubr.msk.bf16.gmra.mxu0 %vm678_vm2, %v929_v49 }
 0x1d1   : > { %v845_v55 = vadd.f32 %v1868_v43, %v844_v54  ;;  %v911_v56 = vmax.f32 %v853_v52, 0.0 }
 0x1d2   : > { %v1593_v58 = vpop.f32.mrf.mxu1 }
 0x1d3   : > { %v909_v60 = vmax.f32 %v845_v55, 0.0  ;;  %v931_v1 = vpack.c.bf16 %v911_v56, %v910_v61  ;;  %v866_v6 = vadd.f32 %v1593_v58, %v1868_v43 }
 0x1d4   : > { %v857_v62 = vpop.f32.mrf.mxu1 }
 0x1d5   : > { %v930_v63 = vpack.c.bf16 %v909_v60, %v908_v59  ;;  %v858_v3 = vadd.f32 %v1868_v43, %v857_v62  ;;  %v914_v13 = vmax.f32 %v866_v6, 0.0 }
 0x1d6   : > { %v1594_v2 = vpop.f32.mrf.mxu1 }
 0x1d7   : > { %v869_v4 = vadd.f32 %v1594_v2, %v1868_v43  ;;  %1623 = vmatprep.mubr.msk.bf16.mxu0 %vm678_vm2, %v930_v63  ;;  %v912_v10 = vmax.f32 %v858_v3, 0.0 }
 0x1d8   : > { %v860_v5 = vpop.f32.mrf.mxu1  ;;  %1624 = vmatmul.mubr.msk.bf16.gmra.mxu0 %vm678_vm2, %v931_v1 }
 0x1d9   : > { %v861_v7 = vadd.f32 %v1868_v43, %v860_v5  ;;  %v915_v8 = vmax.f32 %v869_v4, 0.0 }
 0x1da   : > { %v1597_v9 = vpop.f32.mrf.mxu1 }
 0x1db   : > { %v913_v12 = vmax.f32 %v861_v7, 0.0  ;;  %v933_v16 = vpack.c.bf16 %v915_v8, %v914_v13  ;;  %v882_v20 = vadd.f32 %v1597_v9, %v1868_v43 }
 0x1dc   : > { %v873_v14 = vpop.f32.mrf.mxu1 }
 0x1dd   : > { %v932_v15 = vpack.c.bf16 %v913_v12, %v912_v10  ;;  %v874_v18 = vadd.f32 %v1868_v43, %v873_v14  ;;  %v918_v26 = vmax.f32 %v882_v20, 0.0 }
 0x1de   : > { %v1598_v17 = vpop.f32.mrf.mxu1 }
 0x1df   : > { %v885_v19 = vadd.f32 %v1598_v17, %v1868_v43  ;;  %1627 = vmatprep.mubr.msk.bf16.mxu0 %vm678_vm2, %v932_v15  ;;  %v916_v24 = vmax.f32 %v874_v18, 0.0 }
 0x1e0   : > { %v876_v21 = vpop.f32.mrf.mxu1  ;;  %1628 = vmatmul.mubr.msk.bf16.gmra.mxu0 %vm678_vm2, %v933_v16 }
 0x1e1   : > { %v877_v22 = vadd.f32 %v1868_v43, %v876_v21  ;;  %v919_v23 = vmax.f32 %v885_v19, 0.0  ;;  %v1928_v43 = vld [vmem:[%s2030_s6] ss:$0 sm:$0xff] }
 0x1e3   : > { %v917_v25 = vmax.f32 %v877_v22, 0.0  ;;  %v935_v0 = vpack.c.bf16 %v919_v23, %v918_v26 }
 0x1e5   : > { %v934_v28 = vpack.c.bf16 %v917_v25, %v916_v24 }
 0x1e7   : > { %1631 = vmatprep.mubr.msk.bf16.mxu0 %vm678_vm2, %v934_v28 }
 0x1e8   : > { %1632 = vmatmul.mubr.msk.bf16.gmra.mxu0 %vm678_vm2, %v935_v0 }
 0x270   : > { %v1605_v11 = vpop.f32.mrf.mxu0 }
 0x271   : > { %v1050_v31 = vadd.f32 %v1605_v11, %v1928_v43 }
 0x272   : > { %v1041_v30 = vpop.f32.mrf.mxu0 }
 0x273   : > { %v1042_v35 = vadd.f32 %v1928_v43, %v1041_v30  ;;  %v1170_v38 = vmax.f32 %v1050_v31, 0.0 }
 0x274   : > { %v1606_v33 = vpop.f32.mrf.mxu0 }
 0x275   : > { %v1053_v36 = vadd.f32 %v1606_v33, %v1928_v43  ;;  %v1168_v41 = vmax.f32 %v1042_v35, 0.0 }
 0x276   : > { %v1044_v37 = vpop.f32.mrf.mxu0 }
 0x277   : > { %v1171_v27 = vmax.f32 %v1053_v36, 0.0  ;;  %v1045_v39 = vadd.f32 %v1928_v43, %v1044_v37 }
 0x278   : > { %v1609_v40 = vpop.f32.mrf.mxu0 }
 0x279   : > { %v1934_v42 = vpack.c.bf16 %v1171_v27, %v1170_v38  ;;  %v1169_v44 = vmax.f32 %v1045_v39, 0.0  ;;  %v1066_v46 = vadd.f32 %v1609_v40, %v1928_v43 }
 0x27a   : > { %v1057_v45 = vpop.f32.mrf.mxu0 }
 0x27b   : > { %v1936_v57 = vpack.c.bf16 %v1169_v44, %v1168_v41  ;;  %v1058_v48 = vadd.f32 %v1928_v43, %v1057_v45  ;;  %v1174_v51 = vmax.f32 %v1066_v46, 0.0 }
 0x27c   : > { %v1610_v47 = vpop.f32.mrf.mxu0 }
 0x27d   : > { %v1069_v49 = vadd.f32 %v1610_v47, %v1928_v43  ;;  %v1172_v55 = vmax.f32 %v1058_v48, 0.0 }
 0x27e   : > { %v1060_v50 = vpop.f32.mrf.mxu0 }
 0x27f   : > { %v1175_v52 = vmax.f32 %v1069_v49, 0.0  ;;  %v1061_v53 = vadd.f32 %v1928_v43, %v1060_v50 }
 0x280   : > { %v1942_v54 = vpop.f32.mrf.mxu0 }
 0x281   : > { %v1944_v56 = vpack.c.bf16 %v1175_v52, %v1174_v51  ;;  %v1173_v58 = vmax.f32 %v1061_v53, 0.0 }
 0x282   : > { %v1946_v59 = vpop.f32.mrf.mxu0 }
 0x283   : > { %v1948_v60 = vpack.c.bf16 %v1173_v58, %v1172_v55 }
 0x284   : > { %v1614_v61 = vpop.f32.mrf.mxu0 }
 0x285   : > { %v1085_v55 = vadd.f32 %v1614_v61, %v1928_v43 }
 0x286   : > { %v1950_v62 = vpop.f32.mrf.mxu0 }
 0x287   : > { %v1077_v61 = vadd.f32 %v1928_v43, %v1950_v62 }
 0x288   : > { %v1617_v63 = vpop.f32.mrf.mxu0 }
 0x289   : > { %v1098_v11 = vadd.f32 %v1617_v63, %v1928_v43 }
 0x28a   : > { %v1089_v1 = vpop.f32.mrf.mxu0 }
 0x28b   : > { %v1182_v34 = vmax.f32 %v1098_v11, 0.0  ;;  %v1090_v44 = vadd.f32 %v1928_v43, %v1089_v1  ;;  %v1082_v1 = vadd.f32 %v1942_v54, %v1928_v43  ;;  %v1074_v54 = vadd.f32 %v1928_v43, %v1946_v59 }
 0x28c   : > { %v1618_v2 = vpop.f32.mrf.mxu0 }
 0x28d   : > { %v1101_v28 = vadd.f32 %v1618_v2, %v1928_v43  ;;  %v1180_v52 = vmax.f32 %v1090_v44, 0.0 }
 0x28e   : > { %v1092_v3 = vpop.f32.mrf.mxu0 }
 0x28f   : > { %v1183_v31 = vmax.f32 %v1101_v28, 0.0  ;;  %v1093_v37 = vadd.f32 %v1928_v43, %v1092_v3  ;;  %v1179_v3 = vmax.f32 %v1085_v55, 0.0 }
 0x290   : > { %v1621_v4 = vpop.f32.mrf.mxu0 }
 0x291   : > { %v1114_v5 = vadd.f32 %v1621_v4, %v1928_v43  ;;  %v1208_v27 = vpack.c.bf16 %v1183_v31, %v1182_v34  ;;  %v1181_v48 = vmax.f32 %v1093_v37, 0.0  ;;  %v1240_v31 = vsel %vm678_vm2, %v1944_v56, 0 }
 0x292   : > { %v1105_v6 = vpop.f32.mrf.mxu0  ;;  %v1231_v56 = vsel %vm678_vm2, %v1936_v57, 0 }
 0x293   : > { %v1106_v8 = vadd.f32 %v1928_v43, %v1105_v6  ;;  %v1186_v12 = vmax.f32 %v1114_v5, 0.0  ;;  %v1252_v51 = vsel %vm678_vm2, %v1208_v27, 0  ;;  %v1207_v58 = vpack.c.bf16 %v1181_v48, %v1180_v52 }
 0x294   : > { %v1622_v7 = vpop.f32.mrf.mxu0 }
 0x295   : > { %v1117_v9 = vadd.f32 %v1622_v7, %v1928_v43  ;;  %v1184_v16 = vmax.f32 %v1106_v8, 0.0  ;;  %v1249_v5 = vsel %vm678_vm2, %v1207_v58, 0  ;;  %v1178_v7 = vmax.f32 %v1082_v1, 0.0 }
 0x296   : > { %v1108_v10 = vpop.f32.mrf.mxu0 }
 0x297   : > { %v1187_v13 = vmax.f32 %v1117_v9, 0.0  ;;  %v1109_v14 = vadd.f32 %v1928_v43, %v1108_v10  ;;  %v1206_v9 = vpack.c.bf16 %v1179_v3, %v1178_v7 }
 0x298   : > { %v1956_v15 = vpop.f32.mrf.mxu0 }
 0x299   : > { %v1958_v17 = vpack.c.bf16 %v1187_v13, %v1186_v12  ;;  %v1185_v18 = vmax.f32 %v1109_v14, 0.0  ;;  %v1177_v13 = vmax.f32 %v1077_v61, 0.0 }
 0x29a   : > { %v1960_v19 = vpop.f32.mrf.mxu0 }
 0x29b   : > { %v1962_v20 = vpack.c.bf16 %v1185_v18, %v1184_v16  ;;  %v1246_v18 = vsel %vm678_vm2, %v1206_v9, 0 }
 0x29c   : > { %v1626_v21 = vpop.f32.mrf.mxu0 }
 0x29d   : > { %v1133_v14 = vadd.f32 %v1626_v21, %v1928_v43  ;;  %v1122_v21 = vadd.f32 %v1928_v43, %v1960_v19  ;;  %v1223_v19 = vlaneseq }
 0x29e   : > { %v1964_v22 = vpop.f32.mrf.mxu0 }
 0x29f   : > { %v1191_v62 = vmax.f32 %v1133_v14, 0.0  ;;  %v1125_v59 = vadd.f32 %v1928_v43, %v1964_v22  ;;  %v1237_v22 = vsel %vm678_vm2, %v1948_v60, 0  ;;  %v1224_v60 = vshrl.u32 %v1223_v19, 7 }
 0x2a0   : > { %v1629_v23 = vpop.f32.mrf.mxu0  ;;  %vm1339_vm3 = vcmp.lt.s32.totalorder %v1223_v19, 256 }
 0x2a1   : > { %v1146_v53 = vadd.f32 %v1629_v23, %v1928_v43  ;;  %v1176_v23 = vmax.f32 %v1074_v54, 0.0  ;;  %v1189_v11 = vmax.f32 %v1125_v59, 0.0 }
 0x2a2   : > { %v1137_v24 = vpop.f32.mrf.mxu0 }
 0x2a3   : > { %v1194_v2 = vmax.f32 %v1146_v53, 0.0  ;;  %v1138_v8 = vadd.f32 %v1928_v43, %v1137_v24  ;;  %v1130_v24 = vadd.f32 %v1956_v15, %v1928_v43 }
 0x2a4   : > { %v1630_v25 = vpop.f32.mrf.mxu0 }
 0x2a5   : > { %v1149_v49 = vadd.f32 %v1630_v25, %v1928_v43  ;;  %v1192_v12 = vmax.f32 %v1138_v8, 0.0  ;;  %v1205_v25 = vpack.c.bf16 %v1177_v13, %v1176_v23 }
 0x2a6   : > { %v1140_v26 = vpop.f32.mrf.mxu0 }
 0x2a7   : > { %v1195_v63 = vmax.f32 %v1149_v49, 0.0  ;;  %v1141_v6 = vadd.f32 %v1928_v43, %v1140_v26  ;;  %v1190_v26 = vmax.f32 %v1130_v24, 0.0 }
 0x2a8   : > { %v1633_v0 = vpop.f32.mrf.mxu0 }
 0x2a9   : > { %v1162_v32 = vadd.f32 %v1633_v0, %v1928_v43  ;;  %v1214_v4 = vpack.c.bf16 %v1195_v63, %v1194_v2  ;;  %v1193_v10 = vmax.f32 %v1141_v6, 0.0  ;;  %v1212_v28 = vpack.c.bf16 %v1191_v62, %v1190_v26 }
 0x2aa   : > { %v1153_v30 = vpop.f32.mrf.mxu0  ;;  %v1243_v0 = vsel %vm678_vm2, %v1205_v25, 0 }
 0x2ab   : > { %v1154_v35 = vadd.f32 %v1928_v43, %v1153_v30  ;;  %v1198_v39 = vmax.f32 %v1162_v32, 0.0  ;;  %v1213_v16 = vpack.c.bf16 %v1193_v10, %v1192_v12  ;;  %v1188_v30 = vmax.f32 %v1122_v21, 0.0 }
 0x2ac   : > { %v1634_v33 = vpop.f32.mrf.mxu0  ;;  %v1225_v32 = vsub.s32 0, %v1224_v60 }
 0x2ad   : > { %v1165_v36 = vadd.f32 %v1634_v33, %v1928_v43  ;;  %v1196_v45 = vmax.f32 %v1154_v35, 0.0  ;;  %v1211_v15 = vpack.c.bf16 %v1189_v11, %v1188_v30  ;;  %v1671_v33 = vmov 1966171168  }
 0x2ae   : > { %v1156_v38 = vpop.f32.mrf.mxu0  ;;  %v1323_v34 = vunpack.c.l.s4 %v1671_v33 }
 0x2af   : > { %v1199_v40 = vmax.f32 %v1165_v36, 0.0  ;;  %v1157_v41 = vadd.f32 %v1928_v43, %v1156_v38  ;;  %v1234_v43 = vsel %vm678_vm2, %v1934_v42, 0 }
 0x2b0   : > { %v1324_v35 = vunpack.c.0.s8 %v1323_v34 }
 0x2b1   : > { %v1216_v46 = vpack.c.bf16 %v1199_v40, %v1198_v39  ;;  %v1197_v47 = vmax.f32 %v1157_v41, 0.0 }
 0x2b2   : > { %v1327_v57 = vsub.s32 %v1324_v35, %v1224_v60 }
 0x2b3   : > { %v1215_v50 = vpack.c.bf16 %v1197_v47, %v1196_v45  ;;  %1639 = vmatprep.subr.msk.bf16.mxu1 %vm678_vm2, %v1216_v46 }
 0x2b4   : > { %1512 = vmatpush3.bf16.xpose.msra.mxu1 %v1252_v51 }
 0x2b5   : > { %1640 = vmatprep.subr.msk.bf16.mxu1 %vm678_vm2, %v1215_v50 }
 0x2bc   : > { %1514 = vmatpush3.bf16.xpose.msra.mxu1 %v1249_v5 }
 0x2bd   : > { %1641 = vmatprep.subr.msk.bf16.mxu1 %vm678_vm2, %v1214_v4 }
 0x2c4   : > { %1516 = vmatpush3.bf16.xpose.msra.mxu1 %v1246_v18 }
 0x2c5   : > { %1642 = vmatprep.subr.msk.bf16.mxu1 %vm678_vm2, %v1213_v16 }
 0x2cc   : > { %1518 = vmatpush3.bf16.xpose.msra.mxu1 %v1243_v0 }
 0x2cd   : > { %1643 = vmatprep.subr.msk.bf16.mxu1 %vm678_vm2, %v1212_v28 }
 0x2d4   : > { %1520 = vmatpush3.bf16.xpose.msra.mxu1 %v1240_v31 }
 0x2d5   : > { %1644 = vmatprep.subr.msk.bf16.mxu1 %vm678_vm2, %v1211_v15 }
 0x2dc   : > { %1522 = vmatpush3.bf16.xpose.msra.mxu1 %v1237_v22 }
 0x2dd   : > { %1645 = vmatprep.subr.msk.bf16.mxu1 %vm678_vm2, %v1958_v17  ;;  %v1221_v17 = vpop.permute.xlu0 %1220 }
 0x2de   : > { %v1226_v42 = vrot.slane %v1221_v17, %v1225_v32 }
 0x2e4   : > { %1524 = vmatpush3.bf16.xpose.msra.mxu1 %v1234_v43 }
 0x2e5   : > { %1646 = vmatprep.subr.msk.bf16.mxu1 %vm678_vm2, %v1962_v20 }
 0x2ec   : > { %1526 = vmatpush3.bf16.xpose.msra.mxu1 %v1231_v56 }
 0x2f3   : > { %1528 = vmatmul.mubr.msk.bf16.vlgmr.msra.gmra.mxu1 %vm678_vm2, %v1921_v29 }
 0x3b3   : > { %v1312_v36 = vpop.f32.mrf.mxu1 }
 0x3b4   : > { %v1313_v37 = vadd.f32 %v1312_v36, %v1226_v42 }
 0x3b5   : > { %v1314_v20 = vpop.f32.mrf.mxu1 }
 0x3b6   : > { %v1315_v38 = vadd.f32 %v1314_v20, %v1226_v42 }
 0x3b7   : > { %v1316_v27 = vpop.f32.mrf.mxu1 }
 0x3b8   : > { %v1321_v39 = vcombine.low %v1313_v37, %v1315_v38 }
 0x3b9   : > { %v1317_v29 = vpop.f32.mrf.mxu1 }
 0x3ba   : > { %v1328_v40 = vrot.slane %v1321_v39, %v1327_v57 }
 0x3bc   : > { %v1335_v41 = vrot.slane %v1328_v40, %v1327_v57 }
 0x3be   : > { %1341 = vst.msk [vmem:[%s334_s18] sm:$0x3] %vm1339_vm3, %v1335_v41 }
 0x3bf PF: > { %s21_s11 = sadd.s32 1, %s1668_s11  }
 0x3c0   : > { %p18_p5 = scmp.ge.s32.totalorder %s21_s11, 4  }
 0x3c2   :  { %20 = sbr.rel (!%p18_p5) target bundleno = 3 (0x3), region = 86 }

</bundles_post_ra>
